<compile_context>
chip_gen: v5e
topology: v5e:2x2
jax: 0.10.0
libtpu: 0.0.40
codegen_flags: <defaults>
</compile_context>

<pallas_src>
import jax
import jax.numpy as jnp
from jax.experimental import pallas as pl
from jax.experimental.pallas import tpu as pltpu


def _fc_kernel(x_ref, w_ref, b_ref, o_ref):
    # x_ref: (tile_n, in_size)  w_ref: (in_size, tile_o)  b_ref: (1, tile_o)
    acc = jnp.dot(x_ref[...], w_ref[...], preferred_element_type=jnp.float32)
    o_ref[...] = (acc + b_ref[...].astype(jnp.float32)).astype(o_ref.dtype)


def _round_up(x, m):
    return ((x + m - 1) // m) * m


def _round_down(x, m):
    return (x // m) * m


def _vmem_capacity_bytes():
    """Physical VMEM per TensorCore; conservative fallback if unqueryable."""
    try:
        cap = int(pltpu.get_tpu_info().vmem_capacity_bytes)
        if cap > 0:
            return cap
    except Exception:
        pass
    return 64 << 20  # v7x per-TC size: the smallest of the supported chips


def _generation_tiling_params():
    cap = _vmem_capacity_bytes()
    if cap <= (64 << 20):
        # v7x: 64 MiB VMEM per TC and 3.2 TB/s HBM make the fixed ~0.35 us
        # per-grid-step overhead relatively expensive -> go big on tiles.
        return {"budget": 44 << 20, "max_tile_n": 4096, "vmem_ceiling": cap}
    # v5e / v6e: 128 MiB physical. 2048-row tiles sit at ~86%+ of the HBM
    # roofline; vmem_limit_bytes is set explicitly below so the 16/32 MiB
    # scoped defaults can't bite.
    return {"budget": 28 << 20, "max_tile_n": 2048, "vmem_ceiling": cap}


def _pick_tiles(n, in_size, out_size, in_item, w_item, b_item, out_item, gen):
    """Pick (tile_n, tile_o) from the per-generation VMEM pipeline budget."""
    # out_size tiling: keep the whole head if modest, else 512-lane chunks
    # (a multiple of 128 keeps weight/bias/output blocks lane-aligned).
    tile_o = out_size if out_size <= 512 else 512

    # Double-buffered weight + bias per out-tile stay resident; the rest of the
    # budget goes to double-buffered feats rows + double-buffered output rows.
    resident = 2 * (in_size * tile_o * w_item + tile_o * b_item)
    per_row = 2 * in_size * in_item + 2 * tile_o * out_item
    avail = max(gen["budget"] - resident, per_row * 128)
    tile_n = min(avail // per_row, gen["max_tile_n"])

    if n < 256:
        # Too small to tile usefully: one full-extent block (full-dim block
        # shapes also sidestep the (8,128) divisibility rule).
        tile_n = n
    else:
        half = _round_up(pl.cdiv(n, 2), 8)  # balanced 2-way split for mid-size N
        if tile_n >= half:
            # Guarantee >= 2 grid steps (balanced) so ("parallel", ...) can
            # shard across v7x's two TensorCores and the pipeline overlaps.
            tile_n = half
        else:
            tile_n = max(128, _round_down(tile_n, 128))
    return int(tile_n), int(tile_o)


def fc_layer_forward(feats, weight, bias, *, tile_n=None, force_pallas=False):
    """Computes (feats, feats @ weight + bias) with the matmul done in Pallas.

    feats:  (N, in_size)
    weight: (in_size, out_size)
    bias:   (out_size,)
    """
    n, in_size = feats.shape
    out_size = weight.shape[1]

    # Tiny problems: pallas_call launch + per-step overhead dominates; let XLA fuse.
    if not force_pallas and n * in_size * feats.dtype.itemsize < (1 << 20):
        x = (feats @ weight + bias).astype(feats.dtype)
        return feats, x

    in_item = feats.dtype.itemsize
    w_item = weight.dtype.itemsize
    b_item = bias.dtype.itemsize
    out_item = feats.dtype.itemsize

    gen = _generation_tiling_params()
    auto_n, tile_o = _pick_tiles(n, in_size, out_size,
                                 in_item, w_item, b_item, out_item, gen)
    if tile_n is None:
        tile_n = auto_n
    else:
        tile_n = min(n, max(8, _round_down(int(tile_n), 8)))

    bias2d = bias.reshape(1, out_size)
    grid = (pl.cdiv(n, tile_n), pl.cdiv(out_size, tile_o))

    # Explicit VMEM limit sized from the actually-picked tiles (+ headroom),
    # clamped to physical capacity.
    vmem_needed = (2 * tile_n * in_size * in_item        # double-buffered feats tile
                   + 2 * in_size * tile_o * w_item       # double-buffered weight tile
                   + 2 * tile_o * b_item                 # double-buffered bias tile
                   + 2 * tile_n * tile_o * out_item)     # double-buffered output tile
    vmem_limit = int(min(gen["vmem_ceiling"],
                         max(16 << 20, _round_up(vmem_needed + (4 << 20), 1 << 20))))

    cost = pl.CostEstimate(
        flops=2 * n * in_size * out_size,
        transcendentals=0,
        bytes_accessed=(n * in_size * in_item + in_size * out_size * w_item
                        + out_size * b_item + n * out_size * out_item),
    )

    x = pl.pallas_call(
        _fc_kernel,
        out_shape=jax.ShapeDtypeStruct((n, out_size), feats.dtype),
        grid_spec=pltpu.PrefetchScalarGridSpec(
            num_scalar_prefetch=0,
            grid=grid,
            in_specs=[
                pl.BlockSpec((tile_n, in_size), lambda i, j: (i, 0)),
                pl.BlockSpec((in_size, tile_o), lambda i, j: (0, j)),
                pl.BlockSpec((1, tile_o), lambda i, j: (0, j)),
            ],
            out_specs=pl.BlockSpec((tile_n, tile_o), lambda i, j: (i, j)),
        ),
        compiler_params=pltpu.CompilerParams(
            # Rows and output columns are fully independent (no reduction axis
            # in the grid) -> megacore (v7x: 2 TCs) may shard either axis.
            dimension_semantics=("parallel", "parallel"),
            vmem_limit_bytes=vmem_limit,
        ),
        cost_estimate=cost,
    )(feats, weight, bias2d)

    # FCLayer.forward returns (feats, x)
    return feats, x


def init_fc_params(key, in_size, out_size=1, dtype=jnp.float32):
    """Deterministic init mimicking nn.Linear default (uniform +/- 1/sqrt(in_size))."""
    kw, kb = jax.random.split(key)
    bound = 1.0 / (in_size ** 0.5)
    weight = jax.random.uniform(kw, (in_size, out_size), dtype, -bound, bound)
    bias = jax.random.uniform(kb, (out_size,), dtype, -bound, bound)
    return weight, bias


if __name__ == "__main__":
    key = jax.random.PRNGKey(0)
    k1, k2, k3, k4 = jax.random.split(key, 4)

    # Case 1: tiny shapes consistent with the module (N instances x in_size feats).
    N, IN_SIZE, OUT_SIZE = 8, 32, 1
    feats = jax.random.normal(k1, (N, IN_SIZE), dtype=jnp.float32)
    weight, bias = init_fc_params(k2, IN_SIZE, OUT_SIZE)

    # Force the Pallas path so the kernel is actually exercised at demo size.
    feats_out, x = fc_layer_forward(feats, weight, bias, force_pallas=True)
    jax.block_until_ready((feats_out, x))

    x_ref = feats @ weight + bias
    assert feats_out.shape == (N, IN_SIZE)
    assert x.shape == (N, OUT_SIZE)
    assert jnp.allclose(x, x_ref, atol=1e-5, rtol=1e-5)
    assert jnp.array_equal(feats_out, feats)

    # Case 2: ragged N -> cdiv grid, 2 balanced "parallel" steps, clamped
    # trailing partial block, no jnp.pad copy of feats.
    N2, IN2 = 300, 256
    feats2 = jax.random.normal(k3, (N2, IN2), dtype=jnp.float32)
    weight2, bias2 = init_fc_params(k4, IN2, OUT_SIZE)

    feats2_out, x2 = fc_layer_forward(feats2, weight2, bias2, force_pallas=True)
    jax.block_until_ready((feats2_out, x2))

    x2_ref = feats2 @ weight2 + bias2
    assert x2.shape == (N2, OUT_SIZE)
    assert jnp.allclose(x2, x2_ref, atol=1e-5, rtol=1e-5)
    assert jnp.array_equal(feats2_out, feats2)

    # Case 3: small-problem gate falls back to plain XLA (no force), same result.
    _, x3 = fc_layer_forward(feats, weight, bias)
    jax.block_until_ready(x3)
    assert jnp.allclose(x3, x_ref, atol=1e-5, rtol=1e-5)

    print("KERNEL_OK")
</pallas_src>

<mosaic_0001>
module attributes {stable_mosaic.version = 11 : i64} {
  func.func @_fc_kernel(%arg0: i32, %arg1: i32, %arg2: memref<8x32xf32, #tpu.memory_space<vmem>>, %arg3: memref<32x1xf32, #tpu.memory_space<vmem>>, %arg4: memref<1x1xf32, #tpu.memory_space<vmem>>, %arg5: memref<8x1xf32, #tpu.memory_space<vmem>>) attributes {dimension_semantics = [#tpu.dimension_semantics<parallel>, #tpu.dimension_semantics<parallel>], iteration_bounds = array<i64: 1, 1>, scalar_prefetch = 0 : i64, scratch_operands = 0 : i64, tpu.core_type = #tpu.core_type<tc>, window_params = [{transform_indices = @transform_0, window_bounds = array<i64: 8, 32>}, {transform_indices = @transform_1, window_bounds = array<i64: 32, 1>}, {transform_indices = @transform_2, window_bounds = array<i64: 1, 1>}, {transform_indices = @transform_3, window_bounds = array<i64: 8, 1>}]} {
    %c0 = arith.constant 0 : index
    %c0_0 = arith.constant 0 : index
    %0 = vector.load %arg2[%c0, %c0_0] : memref<8x32xf32, #tpu.memory_space<vmem>>, vector<8x32xf32>
    %c0_1 = arith.constant 0 : index
    %c0_2 = arith.constant 0 : index
    %1 = vector.load %arg3[%c0_1, %c0_2] : memref<32x1xf32, #tpu.memory_space<vmem>>, vector<32x1xf32>
    %cst = arith.constant dense<0.000000e+00> : vector<8x1xf32>
    %2 = tpu.matmul %0, %1, %cst {dimension_numbers = #tpu.dot_dimension_numbers<[1], [0], [0], [1], [0, 0, 1, 1], [], []>} : vector<8x32xf32>, vector<32x1xf32>, vector<8x1xf32> -> vector<8x1xf32>
    %c0_3 = arith.constant 0 : index
    %c0_4 = arith.constant 0 : index
    %3 = vector.load %arg4[%c0_3, %c0_4] : memref<1x1xf32, #tpu.memory_space<vmem>>, vector<1x1xf32>
    %4 = vector.broadcast %3 : vector<1x1xf32> to vector<8x1xf32>
    %5 = arith.addf %2, %4 : vector<8x1xf32>
    %c0_5 = arith.constant 0 : index
    %c0_6 = arith.constant 0 : index
    %6 = vector.load %arg5[%c0_5, %c0_6] : memref<8x1xf32, #tpu.memory_space<vmem>>, vector<8x1xf32>
    tpu.vector_store %arg5[%c0_5, %c0_6], %5 {strides = array<i32>} : memref<8x1xf32, #tpu.memory_space<vmem>>, vector<8x1xf32>,
    return
  }
  func.func @transform_0(%arg0: i32, %arg1: i32) -> (i32, i32) {
    %c0_i32 = arith.constant 0 : i32
    %c0_i32_0 = arith.constant 0 : i32
    return %arg0, %c0_i32 : i32, i32
  }
  func.func @transform_1(%arg0: i32, %arg1: i32) -> (i32, i32) {
    %c0_i32 = arith.constant 0 : i32
    %c0_i32_0 = arith.constant 0 : i32
    return %c0_i32, %arg1 : i32, i32
  }
  func.func @transform_2(%arg0: i32, %arg1: i32) -> (i32, i32) {
    %c0_i32 = arith.constant 0 : i32
    %c0_i32_0 = arith.constant 0 : i32
    return %c0_i32, %arg1 : i32, i32
  }
  func.func @transform_3(%arg0: i32, %arg1: i32) -> (i32, i32) {
    %c0_i32 = arith.constant 0 : i32
    return %arg0, %arg1 : i32, i32
  }
}

</mosaic_0001>

<bundles_post_ra>
// kernel: tpu_custom_call.1
= control target key start
LH: loop header
LB: loop body
LE: loop exit
PB: predicated region body
PF: predicated region fallthrough
CT: control target
= control target key end

     0   :  { %vm25_vm0 = vcmask 261120   ;;  %vm49_vm1 = vcmask 7168   ;;  %s98_s1 = inlined_call_operand.vmem [shape: f32[32,1], index: 1, kind: input, shape index: {}]   ;;  %s99_s2 = inlined_call_operand.<no memory space> [shape: f32[1,1], index: 2, kind: input, shape index: {}]   ;;  %s100_s0 = inlined_call_operand.vmem [shape: f32[8,32], index: 0, kind: input, shape index: {}]   ;;  %s101_s3 = inlined_call_operand.vmem [shape: f32[8,1], index: 3, kind: output, shape index: {}]  }
   0x1   :  { %v20_v0 = vld [vmem:[%s98_s1 + $0x18] sm:$0xff]  ;;  %v19_v1 = vld [vmem:[%s98_s1 + $0x10] sm:$0xff]  ;;  %v8_v2 = vstv %s99_s2  ;;  %v18_v3 = vld [vmem:[%s98_s1 + $0x8] sm:$0xff] }
   0x2   :  { %41 = vmatpush.msra.mxu0 %v20_v0  ;;  %9 = vst [vmem:[#allocation2] sm:$0x1] %v8_v2  ;;  %v17_v4 = vld [vmem:[%s98_s1] sm:$0xff] }
   0x3   :  { %v16_v5 = vld [vmem:[%s100_s0] sm:$0xff] }
   0x4   :  { %42 = vmatpush.msra.mxu0 %v19_v1 }
   0x6   :  { %43 = vmatpush.msra.mxu0 %v18_v3 }
   0x8   :  { %44 = vmatpush.msra.mxu0 %v17_v4 }
   0x9   :  { %55 = vmatmul.msk.f32.vlgmr.msra.gmra.mxu0 %vm25_vm0, %v16_v5  ;;  %v56_v6 = vld [vmem:[#allocation2] ss:$0 sm:$0xff] }
  0x86   :  { %v46_v7 = vpop.f32.mrf.mxu0 }
  0x87   :  { %v47_v8 = vadd.f32 %v56_v6, %v46_v7 }
  0x89   :  { %50 = vst.msk [vmem:[%s101_s3] sm:$0xff] %vm49_vm1, %v47_v8 }

</bundles_post_ra>
